<compile_context>
chip_gen: v6e
topology: v6e:2x2x1
jax: 0.10.0
libtpu: 0.0.40
codegen_flags: <defaults>
</compile_context>

<pallas_src>
import functools

import jax
import jax.numpy as jnp
from jax.experimental import pallas as pl
from jax.experimental.pallas import tpu as pltpu


def _round_up(n, m):
    return ((n + m - 1) // m) * m


@functools.lru_cache(maxsize=1)
def _chip_flags():
    """(small_mxu, physical_vmem_bytes) for the local TPU generation."""
    kind = ""
    try:
        kind = jax.devices()[0].device_kind.lower()
    except Exception:
        pass
    # v5e/v5p (and older) have 128-deep MXUs and no packed-bf16 VPU.
    small_mxu = any(t in kind for t in ("v2", "v3", "v4", "v5"))
    phys_vmem = (64 << 20) if "v7" in kind else (128 << 20)
    try:
        phys_vmem = min(phys_vmem, int(pltpu.get_tpu_info().vmem_capacity_bytes))
    except Exception:
        pass
    return small_mxu, phys_vmem


# ---------------------------------------------------------------------------
# Kernel bodies
# ---------------------------------------------------------------------------
def _ln_ffn(x_ref, gamma_ref, beta_ref, w1_ref, b1_ref, w2_ref, b2_ref, bf16_tail):
    """LayerNorm + 2-layer ReLU FFN.  Returns (residual_bf16, y_bf16)."""
    res_b = x_ref[...]                                   # bf16 (tm, d)
    x = res_b.astype(jnp.float32)

    # One-pass LayerNorm stats: mean and E[x^2] together (eps=1e-6).
    mean = jnp.mean(x, axis=-1, keepdims=True)
    msq = jnp.mean(x * x, axis=-1, keepdims=True)
    var = jnp.maximum(msq - mean * mean, 0.0)
    xn = (x - mean) * jax.lax.rsqrt(var + 1e-6)
    xn = xn * gamma_ref[...] + beta_ref[...]

    # FFN: relu(W2 relu(W1 xn + b1) + b2), bf16 MXU operands / f32 accumulation.
    h = jnp.dot(xn.astype(jnp.bfloat16), w1_ref[...],
                preferred_element_type=jnp.float32) + b1_ref[...]
    h_b = (jnp.maximum(h.astype(jnp.bfloat16), 0.0) if bf16_tail
           else jnp.maximum(h, 0.0).astype(jnp.bfloat16))
    y = jnp.dot(h_b, w2_ref[...],
                preferred_element_type=jnp.float32) + b2_ref[...]
    y_b = (jnp.maximum(y.astype(jnp.bfloat16), 0.0) if bf16_tail
           else jnp.maximum(y, 0.0).astype(jnp.bfloat16))
    return res_b, y_b


def _gate_blend(res_b, z_pre, r_pre, g_pre, ug_ref, o_ref, bf16_tail):
    """sigmoid/tanh gate + final (1-z)*res + z*h_hat blend; writes o_ref."""
    z = jax.nn.sigmoid(z_pre)
    r = jax.nn.sigmoid(r_pre)
    rx = (r.astype(jnp.bfloat16) * res_b if bf16_tail
          else (r * res_b.astype(jnp.float32)).astype(jnp.bfloat16))
    h_hat = jnp.tanh(g_pre + jnp.dot(rx, ug_ref[...],
                                     preferred_element_type=jnp.float32))
    if bf16_tail:
        z_b = z.astype(jnp.bfloat16)
        out = (1.0 - z_b) * res_b + z_b * h_hat.astype(jnp.bfloat16)
    else:
        res_f = res_b.astype(jnp.float32)
        out = (1.0 - z) * res_f + z * h_hat
    o_ref[...] = out.astype(o_ref.dtype)


def _ffn_gate_fused_kernel(x_ref, gamma_ref, beta_ref, w1_ref, b1_ref,
                           w2_ref, b2_ref, wgate_ref, bgate_ref, ug_ref,
                           o_ref, *, bf16_tail):
    """v6e/v7x path: one K=2d gate matmul with LHS=[y | residual]."""
    d = o_ref.shape[-1]
    res_b, y_b = _ln_ffn(x_ref, gamma_ref, beta_ref, w1_ref, b1_ref,
                         w2_ref, b2_ref, bf16_tail)
    lhs = jnp.concatenate([y_b, res_b], axis=-1)          # (tm, 2d)
    zrg = jnp.dot(lhs, wgate_ref[...],
                  preferred_element_type=jnp.float32) + bgate_ref[...]
    _gate_blend(res_b, zrg[:, 0:d], zrg[:, d:2 * d], zrg[:, 2 * d:3 * d],
                ug_ref, o_ref, bf16_tail)


def _ffn_gate_split_kernel(x_ref, gamma_ref, beta_ref, w1_ref, b1_ref,
                           w2_ref, b2_ref, wzrg_ref, bgate_ref, uzr_ref,
                           ug_ref, o_ref, *, bf16_tail):
    """v5e path: separate K=d gate matmuls (128x128 MXU already saturated)."""
    d = o_ref.shape[-1]
    res_b, y_b = _ln_ffn(x_ref, gamma_ref, beta_ref, w1_ref, b1_ref,
                         w2_ref, b2_ref, bf16_tail)
    zrg = jnp.dot(y_b, wzrg_ref[...],
                  preferred_element_type=jnp.float32) + bgate_ref[...]
    uzr = jnp.dot(res_b, uzr_ref[...], preferred_element_type=jnp.float32)
    _gate_blend(res_b,
                zrg[:, 0:d] + uzr[:, 0:d],
                zrg[:, d:2 * d] + uzr[:, d:2 * d],
                zrg[:, 2 * d:3 * d],
                ug_ref, o_ref, bf16_tail)


# ---------------------------------------------------------------------------
# Wrapper
# ---------------------------------------------------------------------------
@functools.partial(jax.jit, static_argnames=("tm", "fuse_gate"))
def positionwise_feed_forward(x, kparams, *, tm=1024, fuse_gate=True):
    """x: (..., d_in).  kparams: packed kernel params (see pack_params)."""
    d_in = x.shape[-1]
    orig_shape = x.shape
    orig_dtype = x.dtype
    x2d = x.reshape(-1, d_in).astype(jnp.bfloat16)       # bf16 activation stream
    M = x2d.shape[0]

    dhid = kparams["w1"].shape[1]
    small_mxu, phys_vmem = _chip_flags()
    bf16_tail = not small_mxu                            # packed-bf16 VPU on v6e/v7x

    SUB = 16                                             # bf16 sublane tiling
    tm_eff = min(tm, _round_up(M, SUB))
    M_pad = _round_up(M, tm_eff)
    # Keep at least 2 grid steps when M allows, so the 1-D "parallel" axis can
    # shard across v7x's two TensorCores (harmless on 1-TC chips).
    if M_pad // tm_eff == 1 and M > SUB:
        tm_eff = _round_up((M + 1) // 2, SUB)
        M_pad = _round_up(M, tm_eff)
    if M_pad != M:
        x2d = jnp.pad(x2d, ((0, M_pad - M), (0, 0)))
    grid = (M_pad // tm_eff,)

    row_spec = pl.BlockSpec((tm_eff, d_in), lambda i: (i, 0))

    def full(a):  # resident operand: same (only) block every grid step
        return pl.BlockSpec(a.shape, lambda i, _nd=a.ndim: (0,) * _nd)

    if fuse_gate:
        weights = (kparams["gamma"], kparams["beta"],
                   kparams["w1"], kparams["b1"], kparams["w2"], kparams["b2"],
                   kparams["wgate"], kparams["bgate"], kparams["ug"])
        kernel = functools.partial(_ffn_gate_fused_kernel, bf16_tail=bf16_tail)
    else:
        weights = (kparams["gamma"], kparams["beta"],
                   kparams["w1"], kparams["b1"], kparams["w2"], kparams["b2"],
                   kparams["wgate"], kparams["bgate"], kparams["uzr"],
                   kparams["ug"])
        kernel = functools.partial(_ffn_gate_split_kernel, bf16_tail=bf16_tail)

    # Generation-aware VMEM budget (never above 3/4 of physical VMEM).
    weight_bytes = sum(int(a.size) * a.dtype.itemsize for a in weights)
    tile_bytes = 2 * 2 * tm_eff * d_in * 2               # bf16 x/out, double-buffered
    interm_bytes = tm_eff * (dhid + 14 * d_in) * 4       # f32 intermediates (rough)
    vmem_limit = 2 * weight_bytes + tile_bytes + interm_bytes
    vmem_limit = int(vmem_limit * 1.5) + (8 << 20)
    vmem_limit = max(32 << 20, min(vmem_limit, int(phys_vmem) * 3 // 4))

    gate_factor = 7 if fuse_gate else 6                  # gate matmul FLOP multiplier
    cost = pl.CostEstimate(
        flops=int(4 * M_pad * d_in * dhid + 2 * gate_factor * M_pad * d_in * d_in),
        transcendentals=int(3 * M_pad * d_in),
        bytes_accessed=int(2 * M_pad * d_in * 2 + weight_bytes),
    )

    out2d = pl.pallas_call(
        kernel,
        out_shape=jax.ShapeDtypeStruct((M_pad, d_in), jnp.bfloat16),
        grid_spec=pltpu.PrefetchScalarGridSpec(
            num_scalar_prefetch=0,
            grid=grid,
            in_specs=[row_spec] + [full(a) for a in weights],
            out_specs=row_spec,
        ),
        compiler_params=pltpu.CompilerParams(
            dimension_semantics=("parallel",),
            vmem_limit_bytes=vmem_limit,
        ),
        cost_estimate=cost,
    )(x2d, *weights)

    return out2d[:M].reshape(orig_shape).astype(orig_dtype)


# ---------------------------------------------------------------------------
# Parameter init / packing / reference
# ---------------------------------------------------------------------------
def init_params(key, d_in, dhid, dtype=jnp.float32):
    """Deterministic f32 init mimicking nn.Linear defaults (U(-1/sqrt(fan_in), ..))."""
    ks = jax.random.split(key, 10)

    def lin_w(k, fan_in, fan_out):
        bound = 1.0 / jnp.sqrt(fan_in)
        # stored as (in_features, out_features) so the kernel does x @ W
        return jax.random.uniform(k, (fan_in, fan_out), dtype, -bound, bound)

    def lin_b(k, fan_in, fan_out):
        bound = 1.0 / jnp.sqrt(fan_in)
        return jax.random.uniform(k, (1, fan_out), dtype, -bound, bound)

    return {
        "gamma": jnp.ones((1, d_in), dtype),
        "beta": jnp.zeros((1, d_in), dtype),
        "w1": lin_w(ks[0], d_in, dhid),
        "b1": lin_b(ks[1], d_in, dhid),
        "w2": lin_w(ks[2], dhid, d_in),
        "b2": lin_b(ks[3], dhid, d_in),
        # GRUGate linears (all d_in -> d_in); only w_z has a bias, filled with -2.
        "wr": lin_w(ks[4], d_in, d_in),
        "ur": lin_w(ks[5], d_in, d_in),
        "wz": lin_w(ks[6], d_in, d_in),
        "bz": jnp.full((1, d_in), -2.0, dtype),
        "uz": lin_w(ks[7], d_in, d_in),
        "wg": lin_w(ks[8], d_in, d_in),
        "ug": lin_w(ks[9], d_in, d_in),
    }


def pack_params(p, wdtype=jnp.bfloat16, fuse_gate=True):
    """Pack / fuse params for the kernel (bf16 weights, fused gate weights/bias)."""
    d = p["wz"].shape[0]
    wzrg = jnp.concatenate([p["wz"], p["wr"], p["wg"]], axis=1)          # (d, 3d)
    bgate = jnp.concatenate([p["bz"], jnp.zeros((1, 2 * d), p["bz"].dtype)], axis=1)
    out = {
        "gamma": p["gamma"].astype(jnp.float32),
        "beta": p["beta"].astype(jnp.float32),
        "w1": p["w1"].astype(wdtype),
        "b1": p["b1"].astype(jnp.float32),
        "w2": p["w2"].astype(wdtype),
        "b2": p["b2"].astype(jnp.float32),
        "bgate": bgate.astype(jnp.float32),              # (1, 3d) = [bz | 0 | 0]
        "ug": p["ug"].astype(wdtype),
    }
    if fuse_gate:
        # [[Wz|Wr|Wg],
        #  [Uz|Ur| 0]]  applied to [y | residual]  (K = 2d for 256-deep MXUs)
        uzr0 = jnp.concatenate(
            [p["uz"], p["ur"], jnp.zeros((d, d), p["uz"].dtype)], axis=1)
        out["wgate"] = jnp.concatenate([wzrg, uzr0], axis=0).astype(wdtype)  # (2d, 3d)
    else:
        out["wgate"] = wzrg.astype(wdtype)                                   # (d, 3d)
        out["uzr"] = jnp.concatenate([p["uz"], p["ur"]], axis=1).astype(wdtype)  # (d, 2d)
    return out


def _reference(x, p):
    """Pure-JAX f32 reference for a sanity check."""
    residual = x
    mean = jnp.mean(x, axis=-1, keepdims=True)
    var = jnp.mean((x - mean) ** 2, axis=-1, keepdims=True)
    xn = (x - mean) / jnp.sqrt(var + 1e-6) * p["gamma"][0] + p["beta"][0]
    h = jax.nn.relu(xn @ p["w1"] + p["b1"][0])
    y = jax.nn.relu(h @ p["w2"] + p["b2"][0])
    z = jax.nn.sigmoid(y @ p["wz"] + p["bz"][0] + residual @ p["uz"])
    r = jax.nn.sigmoid(y @ p["wr"] + residual @ p["ur"])
    h_hat = jnp.tanh(y @ p["wg"] + (r * residual) @ p["ug"])
    return (1.0 - z) * residual + z * h_hat


if __name__ == "__main__":
    # Small but lane-dense demo shapes (d_in, dhid multiples of 128); M=32 so the
    # grid has >= 2 steps (exercises the multi-step / megacore path).
    B, S, d_in, dhid = 2, 16, 128, 256
    key = jax.random.PRNGKey(0)
    kx, kp = jax.random.split(key)
    x = jax.random.normal(kx, (B, S, d_in), jnp.float32)
    params = init_params(kp, d_in, dhid)

    small_mxu, _ = _chip_flags()
    fuse_gate = not small_mxu      # K=2d gate packing only pays off on 256-deep MXUs
    kparams = pack_params(params, fuse_gate=fuse_gate)

    out = positionwise_feed_forward(x, kparams, tm=1024, fuse_gate=fuse_gate)
    out = jax.block_until_ready(out)

    ref = _reference(x, params)
    assert out.shape == x.shape
    # bf16 activation stream + bf16 weights (f32 accumulation) vs. the f32
    # reference -> loosened tolerance; an intentional accuracy trade-off.
    max_diff = float(jnp.max(jnp.abs(out - ref)))
    assert jnp.allclose(out, ref, atol=8e-2, rtol=8e-2), (
        "mismatch vs reference; max abs diff = %s" % max_diff)
    # TODO(synk): the PyTorch forward's print() is debug-only and not reproduced.
    print("KERNEL_OK")
</pallas_src>

<mosaic_0001>
module attributes {stable_mosaic.version = 11 : i64} {
  func.func @_ffn_gate_fused_kernel(%arg0: i32, %arg1: memref<16x128xbf16, #tpu.memory_space<vmem>>, %arg2: memref<1x128xf32, #tpu.memory_space<vmem>>, %arg3: memref<1x128xf32, #tpu.memory_space<vmem>>, %arg4: memref<128x256xbf16, #tpu.memory_space<vmem>>, %arg5: memref<1x256xf32, #tpu.memory_space<vmem>>, %arg6: memref<256x128xbf16, #tpu.memory_space<vmem>>, %arg7: memref<1x128xf32, #tpu.memory_space<vmem>>, %arg8: memref<256x384xbf16, #tpu.memory_space<vmem>>, %arg9: memref<1x384xf32, #tpu.memory_space<vmem>>, %arg10: memref<128x128xbf16, #tpu.memory_space<vmem>>, %arg11: memref<16x128xbf16, #tpu.memory_space<vmem>>) attributes {dimension_semantics = [#tpu.dimension_semantics<parallel>], iteration_bounds = array<i64: 2>, scalar_prefetch = 0 : i64, scratch_operands = 0 : i64, tpu.core_type = #tpu.core_type<tc>, window_params = [{transform_indices = @transform_0, window_bounds = array<i64: 16, 128>}, {pipeline_mode = #tpu.pipeline_mode<synchronous>, transform_indices = @transform_1, window_bounds = array<i64: 1, 128>}, {pipeline_mode = #tpu.pipeline_mode<synchronous>, transform_indices = @transform_2, window_bounds = array<i64: 1, 128>}, {pipeline_mode = #tpu.pipeline_mode<synchronous>, transform_indices = @transform_3, window_bounds = array<i64: 128, 256>}, {pipeline_mode = #tpu.pipeline_mode<synchronous>, transform_indices = @transform_4, window_bounds = array<i64: 1, 256>}, {pipeline_mode = #tpu.pipeline_mode<synchronous>, transform_indices = @transform_5, window_bounds = array<i64: 256, 128>}, {pipeline_mode = #tpu.pipeline_mode<synchronous>, transform_indices = @transform_6, window_bounds = array<i64: 1, 128>}, {pipeline_mode = #tpu.pipeline_mode<synchronous>, transform_indices = @transform_7, window_bounds = array<i64: 256, 384>}, {pipeline_mode = #tpu.pipeline_mode<synchronous>, transform_indices = @transform_8, window_bounds = array<i64: 1, 384>}, {pipeline_mode = #tpu.pipeline_mode<synchronous>, transform_indices = @transform_9, window_bounds = array<i64: 128, 128>}, {transform_indices = @transform_10, window_bounds = array<i64: 16, 128>}]} {
    %c0 = arith.constant 0 : index
    %c0_0 = arith.constant 0 : index
    %0 = vector.load %arg1[%c0, %c0_0] : memref<16x128xbf16, #tpu.memory_space<vmem>>, vector<16x128xbf16>
    %1 = arith.extf %0 : vector<16x128xbf16> to vector<16x128xf32>
    %cst = arith.constant dense<0.000000e+00> : vector<16xf32>
    %2 = vector.multi_reduction <add>, %1, %cst [1] : vector<16x128xf32> to vector<16xf32>
    %3 = vector.shape_cast %2 : vector<16xf32> to vector<16x1xf32>
    %cst_1 = arith.constant 1.280000e+02 : f32
    %4 = vector.broadcast %cst_1 : f32 to vector<16x1xf32>
    %5 = arith.divf %3, %4 : vector<16x1xf32>
    %6 = arith.mulf %1, %1 : vector<16x128xf32>
    %cst_2 = arith.constant dense<0.000000e+00> : vector<16xf32>
    %7 = vector.multi_reduction <add>, %6, %cst_2 [1] : vector<16x128xf32> to vector<16xf32>
    %8 = vector.shape_cast %7 : vector<16xf32> to vector<16x1xf32>
    %cst_3 = arith.constant 1.280000e+02 : f32
    %9 = vector.broadcast %cst_3 : f32 to vector<16x1xf32>
    %10 = arith.divf %8, %9 : vector<16x1xf32>
    %11 = arith.mulf %5, %5 : vector<16x1xf32>
    %12 = arith.subf %10, %11 : vector<16x1xf32>
    %cst_4 = arith.constant 0.000000e+00 : f32
    %13 = vector.broadcast %cst_4 : f32 to vector<16x1xf32>
    %14 = arith.maximumf %12, %13 : vector<16x1xf32>
    %15 = vector.broadcast %5 : vector<16x1xf32> to vector<16x128xf32>
    %16 = arith.subf %1, %15 : vector<16x128xf32>
    %cst_5 = arith.constant 9.99999997E-7 : f32
    %17 = vector.broadcast %cst_5 : f32 to vector<16x1xf32>
    %18 = arith.addf %14, %17 : vector<16x1xf32>
    %19 = math.rsqrt %18 : vector<16x1xf32>
    %20 = vector.broadcast %19 : vector<16x1xf32> to vector<16x128xf32>
    %21 = arith.mulf %16, %20 : vector<16x128xf32>
    %c0_6 = arith.constant 0 : index
    %c0_7 = arith.constant 0 : index
    %22 = vector.load %arg2[%c0_6, %c0_7] : memref<1x128xf32, #tpu.memory_space<vmem>>, vector<1x128xf32>
    %23 = vector.broadcast %22 : vector<1x128xf32> to vector<16x128xf32>
    %24 = arith.mulf %21, %23 : vector<16x128xf32>
    %c0_8 = arith.constant 0 : index
    %c0_9 = arith.constant 0 : index
    %25 = vector.load %arg3[%c0_8, %c0_9] : memref<1x128xf32, #tpu.memory_space<vmem>>, vector<1x128xf32>
    %26 = vector.broadcast %25 : vector<1x128xf32> to vector<16x128xf32>
    %27 = arith.addf %24, %26 : vector<16x128xf32>
    %28 = arith.truncf %27 : vector<16x128xf32> to vector<16x128xbf16>
    %c0_10 = arith.constant 0 : index
    %c0_11 = arith.constant 0 : index
    %29 = vector.load %arg4[%c0_10, %c0_11] : memref<128x256xbf16, #tpu.memory_space<vmem>>, vector<128x256xbf16>
    %cst_12 = arith.constant dense<0.000000e+00> : vector<16x256xf32>
    %30 = tpu.matmul %28, %29, %cst_12 {dimension_numbers = #tpu.dot_dimension_numbers<[1], [0], [0], [1], [0, 0, 1, 1], [], []>} : vector<16x128xbf16>, vector<128x256xbf16>, vector<16x256xf32> -> vector<16x256xf32>
    %c0_13 = arith.constant 0 : index
    %c0_14 = arith.constant 0 : index
    %31 = vector.load %arg5[%c0_13, %c0_14] : memref<1x256xf32, #tpu.memory_space<vmem>>, vector<1x256xf32>
    %32 = vector.broadcast %31 : vector<1x256xf32> to vector<16x256xf32>
    %33 = arith.addf %30, %32 : vector<16x256xf32>
    %34 = arith.truncf %33 : vector<16x256xf32> to vector<16x256xbf16>
    %cst_15 = arith.constant 0.000000e+00 : bf16
    %35 = vector.broadcast %cst_15 : bf16 to vector<16x256xbf16>
    %36 = arith.maximumf %34, %35 : vector<16x256xbf16>
    %c0_16 = arith.constant 0 : index
    %c0_17 = arith.constant 0 : index
    %37 = vector.load %arg6[%c0_16, %c0_17] : memref<256x128xbf16, #tpu.memory_space<vmem>>, vector<256x128xbf16>
    %cst_18 = arith.constant dense<0.000000e+00> : vector<16x128xf32>
    %38 = tpu.matmul %36, %37, %cst_18 {dimension_numbers = #tpu.dot_dimension_numbers<[1], [0], [0], [1], [0, 0, 1, 1], [], []>} : vector<16x256xbf16>, vector<256x128xbf16>, vector<16x128xf32> -> vector<16x128xf32>
    %c0_19 = arith.constant 0 : index
    %c0_20 = arith.constant 0 : index
    %39 = vector.load %arg7[%c0_19, %c0_20] : memref<1x128xf32, #tpu.memory_space<vmem>>, vector<1x128xf32>
    %40 = vector.broadcast %39 : vector<1x128xf32> to vector<16x128xf32>
    %41 = arith.addf %38, %40 : vector<16x128xf32>
    %42 = arith.truncf %41 : vector<16x128xf32> to vector<16x128xbf16>
    %cst_21 = arith.constant 0.000000e+00 : bf16
    %43 = vector.broadcast %cst_21 : bf16 to vector<16x128xbf16>
    %44 = arith.maximumf %42, %43 : vector<16x128xbf16>
    %45 = tpu.concatenate %44, %0 in 1 : vector<16x128xbf16>, vector<16x128xbf16> -> vector<16x256xbf16>
    %c0_22 = arith.constant 0 : index
    %c0_23 = arith.constant 0 : index
    %46 = vector.load %arg8[%c0_22, %c0_23] : memref<256x384xbf16, #tpu.memory_space<vmem>>, vector<256x384xbf16>
    %cst_24 = arith.constant dense<0.000000e+00> : vector<16x384xf32>
    %47 = tpu.matmul %45, %46, %cst_24 {dimension_numbers = #tpu.dot_dimension_numbers<[1], [0], [0], [1], [0, 0, 1, 1], [], []>} : vector<16x256xbf16>, vector<256x384xbf16>, vector<16x384xf32> -> vector<16x384xf32>
    %c0_25 = arith.constant 0 : index
    %c0_26 = arith.constant 0 : index
    %48 = vector.load %arg9[%c0_25, %c0_26] : memref<1x384xf32, #tpu.memory_space<vmem>>, vector<1x384xf32>
    %49 = vector.broadcast %48 : vector<1x384xf32> to vector<16x384xf32>
    %50 = arith.addf %47, %49 : vector<16x384xf32>
    %51 = vector.extract_strided_slice %50 {offsets = [0, 0], sizes = [16, 128], strides = [1, 1]} : vector<16x384xf32> to vector<16x128xf32>
    %52 = vector.extract_strided_slice %50 {offsets = [0, 128], sizes = [16, 128], strides = [1, 1]} : vector<16x384xf32> to vector<16x128xf32>
    %53 = vector.extract_strided_slice %50 {offsets = [0, 256], sizes = [16, 128], strides = [1, 1]} : vector<16x384xf32> to vector<16x128xf32>
    %54 = arith.negf %51 : vector<16x128xf32>
    %55 = math.exp %54 : vector<16x128xf32>
    %cst_27 = arith.constant 1.000000e+00 : f32
    %56 = vector.broadcast %cst_27 : f32 to vector<16x128xf32>
    %57 = arith.addf %56, %55 : vector<16x128xf32>
    %58 = arith.divf %56, %57 : vector<16x128xf32>
    %59 = arith.negf %52 : vector<16x128xf32>
    %60 = math.exp %59 : vector<16x128xf32>
    %cst_28 = arith.constant 1.000000e+00 : f32
    %61 = vector.broadcast %cst_28 : f32 to vector<16x128xf32>
    %62 = arith.addf %61, %60 : vector<16x128xf32>
    %63 = arith.divf %61, %62 : vector<16x128xf32>
    %64 = arith.truncf %63 : vector<16x128xf32> to vector<16x128xbf16>
    %65 = arith.mulf %64, %0 : vector<16x128xbf16>
    %c0_29 = arith.constant 0 : index
    %c0_30 = arith.constant 0 : index
    %66 = vector.load %arg10[%c0_29, %c0_30] : memref<128x128xbf16, #tpu.memory_space<vmem>>, vector<128x128xbf16>
    %cst_31 = arith.constant dense<0.000000e+00> : vector<16x128xf32>
    %67 = tpu.matmul %65, %66, %cst_31 {dimension_numbers = #tpu.dot_dimension_numbers<[1], [0], [0], [1], [0, 0, 1, 1], [], []>} : vector<16x128xbf16>, vector<128x128xbf16>, vector<16x128xf32> -> vector<16x128xf32>
    %68 = arith.addf %53, %67 : vector<16x128xf32>
    %69 = math.tanh %68 : vector<16x128xf32>
    %70 = arith.truncf %58 : vector<16x128xf32> to vector<16x128xbf16>
    %cst_32 = arith.constant 1.000000e+00 : bf16
    %71 = vector.broadcast %cst_32 : bf16 to vector<16x128xbf16>
    %72 = arith.subf %71, %70 : vector<16x128xbf16>
    %73 = arith.mulf %72, %0 : vector<16x128xbf16>
    %74 = arith.truncf %69 : vector<16x128xf32> to vector<16x128xbf16>
    %75 = arith.mulf %70, %74 : vector<16x128xbf16>
    %76 = arith.addf %73, %75 : vector<16x128xbf16>
    %c0_33 = arith.constant 0 : index
    %c0_34 = arith.constant 0 : index
    %77 = vector.load %arg11[%c0_33, %c0_34] : memref<16x128xbf16, #tpu.memory_space<vmem>>, vector<16x128xbf16>
    tpu.vector_store %arg11[%c0_33, %c0_34], %76 {strides = array<i32>} : memref<16x128xbf16, #tpu.memory_space<vmem>>, vector<16x128xbf16>,
    return
  }
  func.func @transform_0(%arg0: i32) -> (i32, i32) {
    %c0_i32 = arith.constant 0 : i32
    %c0_i32_0 = arith.constant 0 : i32
    return %arg0, %c0_i32 : i32, i32
  }
  func.func @transform_1(%arg0: i32) -> (i32, i32) {
    %c0_i32 = arith.constant 0 : i32
    %c0_i32_0 = arith.constant 0 : i32
    %c0_i32_1 = arith.constant 0 : i32
    return %c0_i32, %c0_i32_0 : i32, i32
  }
  func.func @transform_2(%arg0: i32) -> (i32, i32) {
    %c0_i32 = arith.constant 0 : i32
    %c0_i32_0 = arith.constant 0 : i32
    %c0_i32_1 = arith.constant 0 : i32
    return %c0_i32, %c0_i32_0 : i32, i32
  }
  func.func @transform_3(%arg0: i32) -> (i32, i32) {
    %c0_i32 = arith.constant 0 : i32
    %c0_i32_0 = arith.constant 0 : i32
    %c0_i32_1 = arith.constant 0 : i32
    return %c0_i32, %c0_i32_0 : i32, i32
  }
  func.func @transform_4(%arg0: i32) -> (i32, i32) {
    %c0_i32 = arith.constant 0 : i32
    %c0_i32_0 = arith.constant 0 : i32
    %c0_i32_1 = arith.constant 0 : i32
    return %c0_i32, %c0_i32_0 : i32, i32
  }
  func.func @transform_5(%arg0: i32) -> (i32, i32) {
    %c0_i32 = arith.constant 0 : i32
    %c0_i32_0 = arith.constant 0 : i32
    %c0_i32_1 = arith.constant 0 : i32
    return %c0_i32, %c0_i32_0 : i32, i32
  }
  func.func @transform_6(%arg0: i32) -> (i32, i32) {
    %c0_i32 = arith.constant 0 : i32
    %c0_i32_0 = arith.constant 0 : i32
    %c0_i32_1 = arith.constant 0 : i32
    return %c0_i32, %c0_i32_0 : i32, i32
  }
  func.func @transform_7(%arg0: i32) -> (i32, i32) {
    %c0_i32 = arith.constant 0 : i32
    %c0_i32_0 = arith.constant 0 : i32
    %c0_i32_1 = arith.constant 0 : i32
    return %c0_i32, %c0_i32_0 : i32, i32
  }
  func.func @transform_8(%arg0: i32) -> (i32, i32) {
    %c0_i32 = arith.constant 0 : i32
    %c0_i32_0 = arith.constant 0 : i32
    %c0_i32_1 = arith.constant 0 : i32
    return %c0_i32, %c0_i32_0 : i32, i32
  }
  func.func @transform_9(%arg0: i32) -> (i32, i32) {
    %c0_i32 = arith.constant 0 : i32
    %c0_i32_0 = arith.constant 0 : i32
    %c0_i32_1 = arith.constant 0 : i32
    return %c0_i32, %c0_i32_0 : i32, i32
  }
  func.func @transform_10(%arg0: i32) -> (i32, i32) {
    %c0_i32 = arith.constant 0 : i32
    %c0_i32_0 = arith.constant 0 : i32
    return %arg0, %c0_i32 : i32, i32
  }
}

</mosaic_0001>

<bundles_post_ra>
// kernel: positionwise_feed_forward.1
= control target key start
LH: loop header
LB: loop body
LE: loop exit
PB: predicated region body
PF: predicated region fallthrough
CT: control target
= control target key end

     0   :  { %15 = vsyncpa [#allocation3], 0  ;;  %s2221_s0 = inlined_call_operand.vmem [shape: bf16[32,128], index: 0, kind: input, shape index: {}]   ;;  %s2222_s1 = inlined_call_operand.vmem [shape: f32[1,128], index: 1, kind: input, shape index: {}]   ;;  %s2223_s2 = inlined_call_operand.vmem [shape: f32[1,128], index: 2, kind: input, shape index: {}]   ;;  %s2224_s3 = inlined_call_operand.hbm [shape: bf16[128,256], index: 3, kind: input, shape index: {}]   ;;  %s2225_s4 = inlined_call_operand.vmem [shape: f32[1,256], index: 4, kind: input, shape index: {}]   ;;  %s2226_s5 = inlined_call_operand.hbm [shape: bf16[256,128], index: 5, kind: input, shape index: {}]   ;;  %s2227_s6 = inlined_call_operand.vmem [shape: f32[1,128], index: 6, kind: input, shape index: {}]   ;;  %s2228_s7 = inlined_call_operand.hbm [shape: bf16[256,384], index: 7, kind: input, shape index: {}]   ;;  %s2229_s8 = inlined_call_operand.vmem [shape: f32[1,384], index: 8, kind: input, shape index: {}]   ;;  %s2230_s9 = inlined_call_operand.hbm [shape: bf16[128,128], index: 9, kind: input, shape index: {}]   ;;  %s2231_s10 = inlined_call_operand.vmem [shape: bf16[32,128], index: 10, kind: output, shape index: {}]  }
   0x1   :  { %16 = vsyncpa [#allocation5], 0 }
   0x2   :  { %17 = vsyncpa [#allocation8], 0  ;;  %s2061_s13 = smov 0  }
   0x3 LB: > { %s1993_s14 = smov [#allocation4]   ;;  %s1483_s16 = sadd.s32 4294967295, %s1991_s13   ;;  %s1991_s13 = sphi %s2061_s13, %s23_s13  }
   0x4   : > { %s303_s15 = sshll.u32 %s1993_s14, 4  ;;  %p1485_p0 = scmp.ge.s32.totalorder %s1991_s13, 1  ;;  %s304_s15 = int_to_ptr.vmem [resolvable:$true] %s303_s15 }
   0x5   : > { %p269_p1 = scmp.lt.s32.totalorder %s1991_s13, 3  ;;  %p2071_p2 = scmp.eq.s32.totalorder %s1483_s16, 0 }
   0x6   : > { %s1994_s19 = smov [#allocation2]   ;;  %s1995_s22 = smov [#allocation6]  }
   0x7   : > { %p2075_p3 = pnand %p1485_p0, %p269_p1  ;;  %s287_s20 = sshll.u32 %s1994_s19, 4  ;;  %s2081_s20 = int_to_ptr.vmem [resolvable:$true] %s287_s20 }
   0x8   : > { %s2089_s23 = sshll.u32 %s1995_s22, 4  ;;  %s1880_s24 = scalar_lea.vmem %s304_s15, 2048  ;;  %s320_s23 = int_to_ptr.vmem [resolvable:$true] %s2089_s23 }
   0x9   : > { %p1689_p4 = pneg %p2075_p3  ;;  %p1881_p7 = scmp.ne.s32.totalorder %s304_s15, %s1880_s24 }
   0xa   : > { %p1888_p10 = scmp.lt.s32.totalorder %s304_s15, %s304_s15  ;;  %p1889_p11 = scmp.lt.s32.totalorder %s1880_s24, %s1880_s24 }
   0xb   : > { %p2085_p5 = pnand %p2071_p2, %p1689_p4 }
   0xc   : > { %p1890_p12 = por %p1889_p11, %p1888_p10 }
   0xd   : > { %p1871_p6 = pneg %p2085_p5 }
   0xf   : > { %p1883_p8 = pnand %p1881_p7, %p1871_p6 }
  0x11   : > { %p1884_p9 = pneg %p1883_p8 }
  0x13   : > { %p1891_p13 = pnand %p1890_p12, %p1884_p9 }
  0x15   : > { %1894 = shalt.err (!%p1891_p13)
}
  0x16   : > { %s1996_s25 = smov 64   ;;  %s1997_s26 = smov 4  }
  0x17   : > { %1695 = dma.hbm_to_vmem [thread:$0]  (!%p2085_p5), %s2226_s5, 2048, %s304_s15, [#allocation5], %s1996_s25, %s1996_s25, %s1997_s26  }
  0x18   : > { %s1906_s29 = scalar_lea.vmem %s2081_s20, 2048  ;;  %p1914_p7 = scmp.lt.s32.totalorder %s2081_s20, %s2081_s20 }
  0x19   : > { %p1907_p0 = scmp.ne.s32.totalorder %s2081_s20, %s1906_s29  ;;  %p1915_p8 = scmp.lt.s32.totalorder %s1906_s29, %s1906_s29 }
  0x1b   : > { %p1909_p1 = pnand %p1907_p0, %p1871_p6  ;;  %p1916_p9 = por %p1915_p8, %p1914_p7 }
  0x1d   : > { %p1910_p4 = pneg %p1909_p1 }
  0x1f   : > { %p1917_p10 = pnand %p1916_p9, %p1910_p4 }
  0x21   : > { %1920 = shalt.err (!%p1917_p10)
}
  0x22   : > { %s1998_s30 = smov 128   ;;  %s1999_s11 = smov 8  }
  0x23   : > { %1692 = dma.hbm_to_vmem [thread:$0]  (!%p2085_p5), %s2224_s3, 2048, %s2081_s20, [#allocation3], %s1998_s30, %s1998_s30, %s1999_s11  }
  0x24   : > { %s1932_s15 = scalar_lea.vmem %s320_s23, 6144  ;;  %p1940_p0 = scmp.lt.s32.totalorder %s320_s23, %s320_s23 }
  0x25   : > { %p1933_p11 = scmp.ne.s32.totalorder %s320_s23, %s1932_s15  ;;  %p1941_p1 = scmp.lt.s32.totalorder %s1932_s15, %s1932_s15 }
  0x27   : > { %p1935_p12 = pnand %p1933_p11, %p1871_p6  ;;  %p1942_p4 = por %p1941_p1, %p1940_p0 }
  0x29   : > { %p1936_p13 = pneg %p1935_p12 }
  0x2b   : > { %p1943_p7 = pnand %p1942_p4, %p1936_p13 }
  0x2d   : > { %1946 = shalt.err (!%p1943_p7)
}
  0x2e   : > { %s2000_s19 = smov 192   ;;  %s2001_s22 = smov 12  }
  0x2f   : > { %1698 = dma.hbm_to_vmem [thread:$0]  (!%p2085_p5), %s2228_s7, 6144, %s320_s23, [#allocation5], %s2000_s19, %s2000_s19, %s2001_s22  }
  0x30   : > { %s2002_s20 = smov [#allocation7]  }
  0x31   : > { %s335_s28 = sshll.u32 %s2002_s20, 4  ;;  %s336_s28 = int_to_ptr.vmem [resolvable:$true] %s335_s28 }
  0x32   : > { %s1958_s29 = scalar_lea.vmem %s336_s28, 1024  ;;  %p1966_p11 = scmp.lt.s32.totalorder %s336_s28, %s336_s28 }
  0x33   : > { %p1959_p8 = scmp.ne.s32.totalorder %s336_s28, %s1958_s29  ;;  %p1967_p12 = scmp.lt.s32.totalorder %s1958_s29, %s1958_s29 }
  0x35   : > { %p1961_p9 = pnand %p1959_p8, %p1871_p6  ;;  %p1968_p13 = por %p1967_p12, %p1966_p11 }
  0x37   : > { %p1962_p10 = pneg %p1961_p9 }
  0x39   : > { %p1969_p0 = pnand %p1968_p13, %p1962_p10 }
  0x3b   : > { %1972 = shalt.err (!%p1969_p0)
}
  0x3c   : > { %1701 = dma.hbm_to_vmem [thread:$0]  (!%p2085_p5), %s2230_s9, 1024, %s336_s28, [#allocation8], %s1996_s25, %s1996_s25, %s1997_s26  }
  0x3d   : > { %360 = sbr.rel (%p2075_p3) target bundleno = 1126 (0x466), region = 60 }
  0x42   : > { %1978 = dma.done.wait (%p2071_p2), [#allocation3], 2048  }
  0x43   : > { %1980 = vsyncadd (%p2071_p2), [#allocation3], 4294965248 }
  0x44   : > { %1982 = dma.done.wait (%p2071_p2), [#allocation5], 8192  }
  0x45   : > { %1984 = vsyncadd (%p2071_p2), [#allocation5], 4294959104 }
  0x46   : > { %1986 = dma.done.wait (%p2071_p2), [#allocation8], 1024  }
  0x47   : > { %1988 = vsyncadd (%p2071_p2), [#allocation8], 4294966272  ;;  %s1496_s18 = sshll.u32 %s1483_s16, 1  ;;  %v1732_v5 = vld [vmem:[#allocation2 + $0x74] ss:$8 sps:$4 sm:$0xff]   ;;  %v2003_v16 = vmov 0  }
  0x48   : > { %p411_p3 = scmp.lt.s32.totalorder %s1496_s18, 3  ;;  %v1734_v6 = vld [vmem:[#allocation2 + $0x70] ss:$8 sps:$4 sm:$0xff]   ;;  %584 = vmatprep.subr.bf16.mxu0 %v1732_v5  ;;  %v1735_v7 = vld [vmem:[#allocation2 + $0x64] ss:$8 sps:$4 sm:$0xff]   ;;  %616 = vmatprep.mubr.bf16.mxu0 %v2003_v16  ;;  %vm2005_vm0 = vmmov 0  }
  0x49   : > { %585 = vmatpush1.bf16.msra.mxu0 %v1734_v6  ;;  %v1737_v8 = vld [vmem:[#allocation2 + $0x60] ss:$8 sps:$4 sm:$0xff]   ;;  %v1738_v9 = vld [vmem:[#allocation2 + $0x54] ss:$8 sps:$4 sm:$0xff]   ;;  %v1740_v10 = vld [vmem:[#allocation2 + $0x50] ss:$8 sps:$4 sm:$0xff]  }
  0x4a   : > { %s2236_s18 = smov (!%p411_p3, %s1496_s18), 3  ;;  %586 = vmatprep.subr.bf16.mxu0 %v1735_v7  ;;  %v1741_v11 = vld [vmem:[#allocation2 + $0x44] ss:$8 sps:$4 sm:$0xff]   ;;  %v1743_v12 = vld [vmem:[#allocation2 + $0x40] ss:$8 sps:$4 sm:$0xff]   ;;  %v1756_v22 = vld [vmem:[#allocation4 + $0x78] sm:$0xff]  }
  0x4b   : > { %s1497_s21 = sshll.u32 %s2236_s18, 2  ;;  %v1744_v13 = vld [vmem:[#allocation2 + $0x34] ss:$8 sps:$4 sm:$0xff]   ;;  %v1746_v14 = vld [vmem:[#allocation2 + $0x30] ss:$8 sps:$4 sm:$0xff]   ;;  %1600 = vmatprep.subr.bf16.mxu1 %v1756_v22  ;;  %v1760_v26 = vld [vmem:[#allocation4 + $0x68] sm:$0xff]  }
  0x4c   : > { %s414_s11 = scalar_lea.vmem %s2221_s0, %s1497_s21  ;;  %v1747_v15 = vld [vmem:[#allocation2 + $0x24] ss:$8 sps:$4 sm:$0xff]   ;;  %v1749_v17 = vld [vmem:[#allocation2 + $0x20] ss:$8 sps:$4 sm:$0xff]   ;;  %v1750_v18 = vld [vmem:[#allocation2 + $0x14] ss:$8 sps:$4 sm:$0xff]   ;;  %s420_s23 = scalar_lea.vmem %s2231_s10, %s1497_s21 }
  0x4d   : > { %v2161_v0 = vld [vmem:[%s414_s11] sm:$0xff]   ;;  %587 = vmatpush1.bf16.msra.mxu0 %v1737_v8  ;;  %v1752_v19 = vld [vmem:[#allocation2 + $0x10] ss:$8 sps:$4 sm:$0xff]   ;;  %v1761_v27 = vld [vmem:[#allocation4 + $0x28] sm:$0xff]  }
  0x4e   : > { %v2164_v1 = vunpack.c.l.bf16 %v2161_v0  ;;  %v2167_v2 = vunpack.c.h.bf16 %v2161_v0  ;;  %588 = vmatprep.subr.bf16.mxu0 %v1738_v9  ;;  %v1753_v20 = vld [vmem:[#allocation2 + $0x4] ss:$8 sps:$4 sm:$0xff]   ;;  %v1755_v21 = vld [vmem:[#allocation2] ss:$8 sps:$4 sm:$0xff]   ;;  %v1757_v23 = vld [vmem:[#allocation4 + $0x38] sm:$0xff]  }
  0x4f   : > { %v1758_v24 = vld [vmem:[#allocation4 + $0x70] sm:$0xff]   ;;  %1601 = vmatpush3.bf16.msra.mxu1 %v1757_v23  ;;  %v1762_v28 = vld [vmem:[#allocation4 + $0x60] sm:$0xff]   ;;  %v1764_v30 = vld [vmem:[#allocation4 + $0x58] sm:$0xff]  }
  0x50   : > { %428 = vadd.xlane.f32.xlu0 %v2164_v1  ;;  %v435_v3 = vmul.f32 %v2164_v1, %v2164_v1  ;;  %v436_v4 = vmul.f32 %v2167_v2, %v2167_v2  ;;  %v1759_v25 = vld [vmem:[#allocation4 + $0x30] sm:$0xff]   ;;  %1602 = vmatprep.subr.bf16.mxu1 %v1758_v24  ;;  %v1763_v29 = vld [vmem:[#allocation4 + $0x20] sm:$0xff]   ;;  %v1765_v31 = vld [vmem:[#allocation4 + $0x18] sm:$0xff]  }
  0x51   : > { %589 = vmatpush1.bf16.msra.mxu0 %v1740_v10  ;;  %v1500_v51 = vld [vmem:[%s2222_s1] ss:$0 sm:$0xff]  ;;  %v1766_v61 = vld [vmem:[#allocation4 + $0x50] sm:$0xff]   ;;  %v1768_v63 = vld [vmem:[#allocation4 + $0x48] sm:$0xff]  }
  0x52   : > { %437 = vadd.xlane.f32.xlu1 %v435_v3  ;;  %590 = vmatprep.subr.bf16.mxu0 %v1741_v11  ;;  %v1501_v56 = vld [vmem:[%s2223_s2] ss:$0 sm:$0xff]  ;;  %v1767_v62 = vld [vmem:[#allocation4 + $0x10] sm:$0xff]   ;;  %v1774_v5 = vld [vmem:[#allocation6 + $0xac] ss:$12 sps:$4 sm:$0xff]  }
  0x53   : > { %1603 = vmatpush3.bf16.msra.mxu1 %v1759_v25  ;;  %v1771_v3 = vld [vmem:[#allocation4] sm:$0xff]   ;;  %v1775_v7 = vld [vmem:[#allocation6 + $0x90] ss:$12 sps:$4 sm:$0xff]   ;;  %v1798_v22 = vld [vmem:[#allocation6 + $0x16c] ss:$12 sps:$4 sm:$0xff]  }
  0x54   : > { %430 = vadd.xlane.f32.xlu0 %v2167_v2  ;;  %1604 = vmatprep.subr.bf16.mxu1 %v1760_v26  ;;  %v1777_v6 = vld [vmem:[#allocation6 + $0x94] ss:$12 sps:$4 sm:$0xff]   ;;  %v1780_v8 = vld [vmem:[#allocation6 + $0x7c] ss:$12 sps:$4 sm:$0xff]   ;;  %v1778_v10 = vld [vmem:[#allocation6 + $0x78] ss:$12 sps:$4 sm:$0xff]  }
  0x55   : > { %591 = vmatpush1.bf16.msra.mxu0 %v1743_v12  ;;  %v1799_v9 = vld [vmem:[#allocation6 + $0x170] ss:$12 sps:$4 sm:$0xff]   ;;  %v1781_v12 = vld [vmem:[#allocation6 + $0x60] ss:$12 sps:$4 sm:$0xff]   ;;  %v1796_v23 = vld [vmem:[#allocation6 + $0x168] ss:$12 sps:$4 sm:$0xff]  }
  0x56   : > { %439 = vadd.xlane.f32.xlu1 %v436_v4  ;;  %592 = vmatprep.subr.bf16.mxu0 %v1744_v13  ;;  %v1772_v4 = vld [vmem:[#allocation6 + $0xa8] ss:$12 sps:$4 sm:$0xff]   ;;  %v1783_v11 = vld [vmem:[#allocation6 + $0x64] ss:$12 sps:$4 sm:$0xff]   ;;  %v1786_v13 = vld [vmem:[#allocation6 + $0x4c] ss:$12 sps:$4 sm:$0xff]  }
  0x57   : > { %1605 = vmatpush3.bf16.msra.mxu1 %v1761_v27  ;;  %v1803_v24 = vld [vmem:[#allocation6 + $0x154] ss:$12 sps:$4 sm:$0xff]   ;;  %v1801_v25 = vld [vmem:[#allocation6 + $0x150] ss:$12 sps:$4 sm:$0xff]   ;;  %v1806_v27 = vld [vmem:[#allocation6 + $0x138] ss:$12 sps:$4 sm:$0xff]  }
  0x58   : > { %1606 = vmatprep.subr.bf16.mxu1 %v1762_v28  ;;  %v1808_v26 = vld [vmem:[#allocation6 + $0x13c] ss:$12 sps:$4 sm:$0xff]   ;;  %v1813_v28 = vld [vmem:[#allocation6 + $0x124] ss:$12 sps:$4 sm:$0xff]  }
  0x59   : > { %593 = vmatpush1.bf16.msra.mxu0 %v1746_v14  ;;  %v1784_v14 = vld [vmem:[#allocation6 + $0x48] ss:$12 sps:$4 sm:$0xff]  }
  0x5a   : > { %594 = vmatprep.subr.bf16.mxu0 %v1747_v15  ;;  %v1789_v15 = vld [vmem:[#allocation6 + $0x34] ss:$12 sps:$4 sm:$0xff]  }
  0x5b   : > { %1607 = vmatpush3.bf16.msra.mxu1 %v1763_v29  ;;  %v1811_v29 = vld [vmem:[#allocation6 + $0x120] ss:$12 sps:$4 sm:$0xff]  }
  0x5c   : > { %1608 = vmatprep.subr.bf16.mxu1 %v1764_v30  ;;  %v1818_v30 = vld [vmem:[#allocation6 + $0x10c] ss:$12 sps:$4 sm:$0xff]  }
  0x5d   : > { %595 = vmatpush1.bf16.msra.mxu0 %v1749_v17  ;;  %v1787_v17 = vld [vmem:[#allocation6 + $0x30] ss:$12 sps:$4 sm:$0xff]  }
  0x5e   : > { %596 = vmatprep.subr.bf16.mxu0 %v1750_v18  ;;  %v1792_v18 = vld [vmem:[#allocation6 + $0x1c] ss:$12 sps:$4 sm:$0xff]  }
  0x5f   : > { %1609 = vmatpush3.bf16.msra.mxu1 %v1765_v31  ;;  %v1816_v31 = vld [vmem:[#allocation6 + $0x108] ss:$12 sps:$4 sm:$0xff]  }
  0x60   : > { %1610 = vmatprep.subr.bf16.mxu1 %v1766_v61  ;;  %v1824_v61 = vld [vmem:[#allocation6 + $0xf8] ss:$12 sps:$4 sm:$0xff]  }
  0x61   : > { %597 = vmatpush1.bf16.msra.mxu0 %v1752_v19  ;;  %v1790_v19 = vld [vmem:[#allocation6 + $0x18] ss:$12 sps:$4 sm:$0xff]  }
  0x62   : > { %598 = vmatprep.subr.bf16.mxu0 %v1753_v20  ;;  %v1795_v20 = vld [vmem:[#allocation6 + $0x4] ss:$12 sps:$4 sm:$0xff]  }
  0x63   : > { %1611 = vmatpush3.bf16.msra.mxu1 %v1767_v62  ;;  %v1821_v62 = vld [vmem:[#allocation6 + $0xf0] ss:$12 sps:$4 sm:$0xff]  }
  0x64   : > { %1612 = vmatprep.subr.bf16.mxu1 %v1768_v63  ;;  %v1825_v63 = vld [vmem:[#allocation6 + $0x38] ss:$12 sps:$4 sm:$0xff]  }
  0x65   : > { %599 = vmatpush1.bf16.msra.mxu0 %v1755_v21  ;;  %v1793_v21 = vld [vmem:[#allocation6] ss:$12 sps:$4 sm:$0xff]  }
  0x66   : > { %1152 = vmatprep.subr.bf16.mxu0 %v1774_v5  ;;  %v1833_v5 = vld [vmem:[#allocation6 + $0xc4] ss:$12 sps:$4 sm:$0xff]  }
  0xd9   : > { %v429_v32 = vpop.xlane.xlu0 %428 }
  0xda   : > { %v433_v33 = vmul.f32 0.0078125, %v429_v32  ;;  %v494_v32 = vlaneseq }
  0xdb   : > { %v438_v34 = vpop.xlane.xlu1 %437 }
  0xdc   : > { %v443_v35 = vmul.f32 %v433_v33, %v433_v33  ;;  %v441_v36 = vmul.f32 0.0078125, %v438_v34  ;;  %v449_v48 = vsub.f32 %v2164_v1, %v433_v33  ;;  %v1769_v1 = vld [vmem:[#allocation4 + $0x8] sm:$0xff]   ;;  %v2185_v33 = vshrl.u32 %v494_v32, 7 }
  0xdd   : > { %v431_v37 = vpop.xlane.xlu0 %430  ;;  %1613 = vmatpush3.bf16.msra.mxu1 %v1769_v1  ;;  %v1828_v1 = vld [vmem:[#allocation6 + $0xdc] ss:$12 sps:$4 sm:$0xff]  }
  0xde   : > { %v445_v38 = vsub.f32 %v441_v36, %v443_v35  ;;  %v434_v39 = vmul.f32 0.0078125, %v431_v37  ;;  %v496_v34 = vsub.s32 0, %v2185_v33  ;;  %v492_v35 = vld [vmem:[%s2225_s4] sm:$0x3]  ;;  %v500_v36 = vsub.s32 1, %v2185_v33 }
  0xdf   : > { %v440_v40 = vpop.xlane.xlu1 %439 }
  0xe0   : > { %v447_v41 = vmax.f32 %v445_v38, 0.0  ;;  %v444_v42 = vmul.f32 %v434_v39, %v434_v39  ;;  %v442_v43 = vmul.f32 0.0078125, %v440_v40  ;;  %v450_v52 = vsub.f32 %v2167_v2, %v434_v39  ;;  %v1770_v2 = vld [vmem:[#allocation4 + $0x40] sm:$0xff]  }
  0xe1   : > { %1614 = vmatprep.subr.bf16.mxu1 %v1770_v2  ;;  %v497_v38 = vrot.slane %v492_v35, %v496_v34  ;;  %v501_v40 = vrot.slane %v492_v35, %v500_v36  ;;  %v1829_v2 = vld [vmem:[#allocation6 + $0xe0] ss:$12 sps:$4 sm:$0xff]  }
  0xe2   : > { %v451_v44 = vadd.f32 1e-06, %v447_v41  ;;  %v446_v45 = vsub.f32 %v442_v43, %v444_v42  ;;  %1615 = vmatpush3.bf16.msra.mxu1 %v1771_v3  ;;  %v1826_v3 = vld [vmem:[#allocation6 + $0xd8] ss:$12 sps:$4 sm:$0xff]  }
  0xe3   : > { %1622 = vmatprep.subr.bf16.mxu1 %v1799_v9 }
  0xe4   : > { %1845 = vrsqrt.f32 %v451_v44  ;;  %v448_v46 = vmax.f32 %v446_v45, 0.0 }
  0xe6   : > { %v452_v47 = vadd.f32 1e-06, %v448_v46 }
  0xe8   : > { %1847 = vrsqrt.f32 %v452_v47 }
  0xf1   : > { %v1846_v49 = vpop.eup %1845 }
  0xf2   : > { %v455_v50 = vmul.f32 %v1846_v49, %v449_v48 }
  0xf4   : > { %v464_v55 = vmul.f32 %v1500_v51, %v455_v50  ;;  %v1800_v50 = vld [vmem:[#allocation6 + $0xb0] ss:$12 sps:$4 sm:$0xff]  }
  0xf5   : > { %v1848_v53 = vpop.eup %1847 }
  0xf6   : > { %v456_v54 = vmul.f32 %v1848_v53, %v450_v52  ;;  %v473_v58 = vadd.f32 %v1501_v56, %v464_v55  ;;  %v1804_v52 = vld [vmem:[#allocation6 + $0x158] ss:$12 sps:$4 sm:$0xff]   ;;  %v1810_v55 = vld [vmem:[#allocation6 + $0x80] ss:$12 sps:$4 sm:$0xff]  }
  0xf7   : > { %v1805_v53 = vld [vmem:[#allocation6 + $0x98] ss:$12 sps:$4 sm:$0xff]  }
  0xf8   : > { %v465_v57 = vmul.f32 %v1500_v51, %v456_v54  ;;  %v1809_v54 = vld [vmem:[#allocation6 + $0x140] ss:$12 sps:$4 sm:$0xff]  }
  0xfa   : > { %v474_v59 = vadd.f32 %v1501_v56, %v465_v57  ;;  %v1814_v56 = vld [vmem:[#allocation6 + $0x128] ss:$12 sps:$4 sm:$0xff]  }
  0xfb   : > { %v1815_v57 = vld [vmem:[#allocation6 + $0x68] ss:$12 sps:$4 sm:$0xff]  }
  0xfc   : > { %v475_v60 = vpack.c.bf16 %v474_v59, %v473_v58  ;;  %v1819_v58 = vld [vmem:[#allocation6 + $0x110] ss:$12 sps:$4 sm:$0xff]  }
  0xfd   : > { %v1820_v59 = vld [vmem:[#allocation6 + $0x50] ss:$12 sps:$4 sm:$0xff]  }
  0xfe   : > { %617 = vmatmul.mubr.bf16.vlgmr.msra.gmra.mxu0 %v475_v60  ;;  %v1823_v60 = vld [vmem:[#allocation6 + $0xf4] ss:$12 sps:$4 sm:$0xff]  }
  0xff   : > { %1184 = vmatprep.mubr.bf16.mxu0 %v2161_v0  ;;  %1153 = vmatpush1.bf16.msra.mxu0 %v1772_v4  ;;  %v1830_v4 = vld [vmem:[#allocation6 + $0x20] ss:$12 sps:$4 sm:$0xff]  }
 0x100   : > { %1154 = vmatprep.subr.bf16.mxu0 %v1777_v6  ;;  %v1834_v6 = vld [vmem:[#allocation6 + $0xc8] ss:$12 sps:$4 sm:$0xff]  }
 0x103   : > { %1155 = vmatpush1.bf16.msra.mxu0 %v1775_v7  ;;  %v1831_v7 = vld [vmem:[#allocation6 + $0xc0] ss:$12 sps:$4 sm:$0xff]  }
 0x104   : > { %1156 = vmatprep.subr.bf16.mxu0 %v1780_v8  ;;  %v1835_v8 = vld [vmem:[#allocation6 + $0x8] ss:$12 sps:$4 sm:$0xff]  }
 0x107   : > { %1157 = vmatpush1.bf16.msra.mxu0 %v1778_v10 }
 0x108   : > { %1158 = vmatprep.subr.bf16.mxu0 %v1783_v11 }
 0x10b   : > { %1159 = vmatpush1.bf16.msra.mxu0 %v1781_v12 }
 0x10c   : > { %1160 = vmatprep.subr.bf16.mxu0 %v1786_v13  ;;  %v1518_v13 = vld [vmem:[%s2227_s6] ss:$0 sm:$0xff] }
 0x10f   : > { %1161 = vmatpush1.bf16.msra.mxu0 %v1784_v14 }
 0x110   : > { %1162 = vmatprep.subr.bf16.mxu0 %v1789_v15 }
 0x113   : > { %1163 = vmatpush1.bf16.msra.mxu0 %v1787_v17 }
 0x114   : > { %1164 = vmatprep.subr.bf16.mxu0 %v1792_v18 }
 0x117   : > { %1165 = vmatpush1.bf16.msra.mxu0 %v1790_v19 }
 0x118   : > { %1166 = vmatprep.subr.bf16.mxu0 %v1795_v20 }
 0x11b   : > { %1167 = vmatpush1.bf16.msra.mxu0 %v1793_v21  ;;  %v1836_v21 = vld [vmem:[#allocation7 + $0x38] sm:$0xff]  }
 0x11c   : > { %1168 = vmatprep.subr.bf16.mxu0 %v1798_v22  ;;  %v2004_v22 = vmov 0.0  }
 0x11f   : > { %1169 = vmatpush2.bf16.msra.mxu0 %v1796_v23  ;;  %v1837_v23 = vld [vmem:[#allocation7 + $0x30] sm:$0xff]  }
 0x120   : > { %1170 = vmatprep.subr.bf16.mxu0 %v1803_v24  ;;  %v1838_v24 = vld [vmem:[#allocation7 + $0x28] sm:$0xff]  }
 0x123   : > { %1171 = vmatpush2.bf16.msra.mxu0 %v1801_v25  ;;  %v1839_v25 = vld [vmem:[#allocation7 + $0x20] sm:$0xff]  }
 0x124   : > { %1172 = vmatprep.subr.bf16.mxu0 %v1808_v26  ;;  %v1840_v26 = vld [vmem:[#allocation7 + $0x18] sm:$0xff]  }
 0x127   : > { %1173 = vmatpush2.bf16.msra.mxu0 %v1806_v27  ;;  %v1842_v27 = vld [vmem:[#allocation7 + $0x8] sm:$0xff]  }
 0x128   : > { %1174 = vmatprep.subr.bf16.mxu0 %v1813_v28  ;;  %v1843_v28 = vld [vmem:[#allocation7] sm:$0xff]  }
 0x12b   : > { %1175 = vmatpush2.bf16.msra.mxu0 %v1811_v29  ;;  %v879_v29 = vld [vmem:[%s2229_s8] sm:$0x7] }
 0x12c   : > { %1176 = vmatprep.subr.bf16.mxu0 %v1818_v30  ;;  %v884_v30 = vrot.slane %v879_v29, %v496_v34 }
 0x12f   : > { %1177 = vmatpush2.bf16.msra.mxu0 %v1816_v31  ;;  %v888_v31 = vrot.slane %v879_v29, %v500_v36 }
 0x130   : > { %1178 = vmatprep.subr.bf16.mxu0 %v1823_v60 }
 0x133   : > { %1179 = vmatpush2.bf16.msra.mxu0 %v1821_v62 }
 0x134   : > { %1180 = vmatprep.subr.bf16.mxu0 %v1828_v1 }
 0x137   : > { %1181 = vmatpush2.bf16.msra.mxu0 %v1826_v3 }
 0x138   : > { %1182 = vmatprep.subr.bf16.mxu0 %v1833_v5 }
 0x13b   : > { %1183 = vmatpush2.bf16.msra.mxu0 %v1831_v7 }
 0x1be   : > { %v618_v37 = vpop.f32.mrf.mxu0 }
 0x1bf   : > { %v619_v43 = vadd.f32 %v618_v37, %v497_v38 }
 0x1c0   : > { %v620_v39 = vpop.f32.mrf.mxu0 }
 0x1c1   : > { %v621_v45 = vadd.f32 %v620_v39, %v501_v40 }
 0x1c2   : > { %v622_v41 = vpop.f32.mrf.mxu0 }
 0x1c3   : > { %v623_v42 = vadd.f32 %v622_v41, %v497_v38 }
 0x1c4   : > { %v624_v44 = vpop.f32.mrf.mxu0 }
 0x1c5   : > { %v625_v46 = vadd.f32 %v624_v44, %v501_v40  ;;  %v627_v47 = vpack.c.bf16 %v623_v42, %v619_v43 }
 0x1c7   : > { %v628_v48 = vpack.c.bf16 %v625_v46, %v621_v45  ;;  %v629_v51 = vmax.bf16 %v2003_v16, %v627_v47 }
 0x1c9   : > { %v630_v49 = vmax.bf16 %v2003_v16, %v628_v48 }
 0x1cb   : > { %798 = vmatprep.mubr.bf16.mxu1 %v630_v49 }
 0x1cc   : > { %799 = vmatmul.mubr.bf16.vlgmr.msra.gmra.mxu1 %v629_v51 }
 0x1cd   : > { %1623 = vmatpush3.bf16.msra.mxu1 %v1800_v50  ;;  %1227 = vmatprep.mubr.bf16.mxu1 %v2161_v0 }
 0x1ce   : > { %1624 = vmatprep.subr.bf16.mxu1 %v1804_v52 }
 0x1d1   : > { %1625 = vmatpush3.bf16.msra.mxu1 %v1805_v53 }
 0x1d2   : > { %1626 = vmatprep.subr.bf16.mxu1 %v1809_v54 }
 0x1d5   : > { %1627 = vmatpush3.bf16.msra.mxu1 %v1810_v55 }
 0x1d6   : > { %1628 = vmatprep.subr.bf16.mxu1 %v1814_v56 }
 0x1d9   : > { %1629 = vmatpush3.bf16.msra.mxu1 %v1815_v57 }
 0x1da   : > { %1630 = vmatprep.subr.bf16.mxu1 %v1819_v58 }
 0x1dd   : > { %1631 = vmatpush3.bf16.msra.mxu1 %v1820_v59 }
 0x1de   : > { %1632 = vmatprep.subr.bf16.mxu1 %v1824_v61 }
 0x1e1   : > { %1633 = vmatpush3.bf16.msra.mxu1 %v1825_v63  ;;  %v891_v63 = vsub.s32 2, %v2185_v33 }
 0x1e2   : > { %1634 = vmatprep.subr.bf16.mxu1 %v1829_v2 }
 0x1e3   : > { %v892_v3 = vrot.slane %v879_v29, %v891_v63 }
 0x1e5   : > { %1635 = vmatpush3.bf16.msra.mxu1 %v1830_v4 }
 0x1e6   : > { %1636 = vmatprep.subr.bf16.mxu1 %v1834_v6 }
 0x1e9   : > { %1637 = vmatpush3.bf16.msra.mxu1 %v1835_v8 }
 0x1ea   : > { %1653 = vmatprep.subr.bf16.mxu1 %v2004_v22 }
 0x28c   : > { %v1616_v9 = vpop.f32.mrf.mxu1 }
 0x28e   : > { %v1617_v10 = vpop.f32.mrf.mxu1 }
 0x28f   : > { %v1618_v12 = vadd.f32 %v1617_v10, %v1616_v9 }
 0x290   : > { %v1619_v11 = vpop.f32.mrf.mxu1 }
 0x291   : > { %v801_v17 = vadd.f32 %v1618_v12, %v1518_v13 }
 0x292   : > { %v1620_v14 = vpop.f32.mrf.mxu1 }
 0x293   : > { %v1621_v15 = vadd.f32 %v1620_v14, %v1619_v11 }
 0x295   : > { %v804_v18 = vadd.f32 %v1621_v15, %v1518_v13 }
 0x297   : > { %v807_v19 = vpack.c.bf16 %v804_v18, %v801_v17 }
 0x299   : > { %v808_v20 = vmax.bf16 %v2003_v16, %v807_v19  ;;  %v1841_v16 = vld [vmem:[#allocation7 + $0x10] sm:$0xff]  }
 0x29b   : > { %1185 = vmatmul.mubr.bf16.vlgmr.msra.gmra.mxu0 %v808_v20  ;;  %1228 = vmatmul.mubr.bf16.vlgmr.msra.gmra.mxu1 %v808_v20 }
 0x29c   : > { %1654 = vmatpush3.bf16.msra.mxu1 %v1836_v21  ;;  %1669 = vmatprep.mubr.msk.bf16.mxu1 %vm2005_vm0, %v2004_v22 }
 0x29d   : > { %1655 = vmatprep.subr.bf16.mxu1 %v2004_v22 }
 0x2a0   : > { %1656 = vmatpush3.bf16.msra.mxu1 %v1837_v23 }
 0x2a1   : > { %1657 = vmatprep.subr.bf16.mxu1 %v2004_v22 }
 0x2a4   : > { %1658 = vmatpush3.bf16.msra.mxu1 %v1838_v24 }
 0x2a5   : > { %1659 = vmatprep.subr.bf16.mxu1 %v2004_v22 }
 0x2a8   : > { %1660 = vmatpush3.bf16.msra.mxu1 %v1839_v25 }
 0x2a9   : > { %1661 = vmatprep.subr.bf16.mxu1 %v2004_v22 }
 0x2ac   : > { %1662 = vmatpush3.bf16.msra.mxu1 %v1840_v26 }
 0x2ad   : > { %1663 = vmatprep.subr.bf16.mxu1 %v2004_v22 }
 0x2b0   : > { %1664 = vmatpush3.bf16.msra.mxu1 %v1841_v16 }
 0x2b1   : > { %1665 = vmatprep.subr.bf16.mxu1 %v2004_v22 }
 0x2b4   : > { %1666 = vmatpush3.bf16.msra.mxu1 %v1842_v27 }
 0x2b5   : > { %1667 = vmatprep.subr.bf16.mxu1 %v2004_v22 }
 0x2b8   : > { %1668 = vmatpush3.bf16.msra.mxu1 %v1843_v28 }
 0x35b   : > { %v1186_v32 = vpop.f32.mrf.mxu0  ;;  %v1638_v60 = vpop.f32.mrf.mxu1 }
 0x35c   : > { %v1187_v35 = vadd.f32 %v1186_v32, %v884_v30 }
 0x35d   : > { %v1188_v37 = vpop.f32.mrf.mxu0  ;;  %v1639_v61 = vpop.f32.mrf.mxu1 }
 0x35e   : > { %v1584_v38 = vmul.f32 -1.442695, %v1187_v35  ;;  %v1189_v39 = vadd.f32 %v1188_v37, %v888_v31  ;;  %v1640_v1 = vadd.f32 %v1639_v61, %v1638_v60 }
 0x35f   : > { %v1190_v40 = vpop.f32.mrf.mxu0  ;;  %v1641_v62 = vpop.f32.mrf.mxu1 }
 0x360   : > { %1849 = vpow2.f32 %v1584_v38  ;;  %v1586_v41 = vmul.f32 -1.442695, %v1189_v39  ;;  %v1191_v42 = vadd.f32 %v1190_v40, %v884_v30  ;;  %v1230_v5 = vadd.f32 %v1640_v1, %v892_v3 }
 0x361   : > { %v1192_v43 = vpop.f32.mrf.mxu0  ;;  %v1642_v2 = vpop.f32.mrf.mxu1 }
 0x362   : > { %1851 = vpow2.f32 %v1586_v41  ;;  %v1585_v44 = vmul.f32 -1.442695, %v1191_v42  ;;  %v1193_v45 = vadd.f32 %v1192_v43, %v888_v31  ;;  %v1643_v4 = vadd.f32 %v1642_v2, %v1641_v62 }
 0x364   : > { %1853 = vpow2.f32 %v1585_v44  ;;  %v1587_v46 = vmul.f32 -1.442695, %v1193_v45  ;;  %v1233_v9 = vadd.f32 %v1643_v4, %v892_v3 }
 0x366   : > { %1855 = vpow2.f32 %v1587_v46 }
 0x36d   : > { %v1850_v34 = vpop.eup %1849 }
 0x36e   : > { %v1242_v48 = vadd.f32 1.0, %v1850_v34 }
 0x36f   : > { %v1852_v47 = vpop.eup %1851 }
 0x370   : > { %v1254_v49 = vadd.f32 1.0, %v1852_v47  ;;  %1857 = vrcp.f32 %v1242_v48 }
 0x371   : > { %v1854_v36 = vpop.eup %1853 }
 0x372   : > { %v1243_v50 = vadd.f32 1.0, %v1854_v36 }
 0x373   : > { %v1856_v51 = vpop.eup %1855 }
 0x374   : > { %1859 = vrcp.f32 %v1243_v50  ;;  %v1255_v52 = vadd.f32 1.0, %v1856_v51 }
 0x375   : > { %1861 = vrcp.f32 %v1254_v49 }
 0x376   : > { %1863 = vrcp.f32 %v1255_v52 }
 0x37d   : > { %v1858_v53 = vpop.eup %1857 }
 0x381   : > { %v1860_v54 = vpop.eup %1859 }
 0x382   : > { %v1862_v55 = vpop.eup %1861  ;;  %v1371_v56 = vpack.c.bf16 %v1860_v54, %v1858_v53 }
 0x383   : > { %v1864_v57 = vpop.eup %1863 }
 0x384   : > { %v1260_v58 = vpack.c.bf16 %v1864_v57, %v1862_v55  ;;  %v1372_v14 = vsub.bf16 1065369472, %v1371_v56 }
 0x386   : > { %v1261_v59 = vmul.bf16 %v1260_v58, %v2161_v0  ;;  %v1373_v33 = vmul.bf16 %v1372_v14, %v2161_v0 }
 0x388   : > { %1670 = vmatmul.mubr.bf16.vlgmr.msra.gmra.mxu1 %v1261_v59 }
 0x448   : > { %v1360_v6 = vpop.f32.mrf.mxu1 }
 0x449   : > { %v1367_v7 = vadd.f32 %v1360_v6, %v1230_v5 }
 0x44a   : > { %v1671_v8 = vpop.f32.mrf.mxu1 }
 0x44b   : > { %1865 = vtanh.f32 %v1367_v7 }
 0x44c   : > { %v1363_v10 = vpop.f32.mrf.mxu1 }
 0x44d   : > { %v1368_v11 = vadd.f32 %v1363_v10, %v1233_v9 }
 0x44e   : > { %v1672_v12 = vpop.f32.mrf.mxu1 }
 0x44f   : > { %1867 = vtanh.f32 %v1368_v11 }
 0x458   : > { %v1866_v13 = vpop.eup %1865 }
 0x45c   : > { %v1868_v15 = vpop.eup %1867 }
 0x45d   : > { %v1374_v17 = vpack.c.bf16 %v1868_v15, %v1866_v13 }
 0x45f   : > { %v1375_v18 = vmul.bf16 %v1374_v17, %v1371_v56 }
 0x461   : > { %v1376_v19 = vadd.bf16 %v1375_v18, %v1373_v33 }
 0x463   : > { %v1596_v20 = vcombine.low %v1376_v19, %v1376_v19  ;;  %v1597_v21 = vcombine.high %v1376_v19, %v1376_v19 }
 0x465   : > { %1384 = vst [vmem:[%s420_s23] sm:$0xf] %v1596_v20  ;;  %1385 = vst [vmem:[%s420_s23 + $0x4] sm:$0xf] %v1597_v21 }
 0x466 PF: > { %s23_s13 = sadd.s32 1, %s1991_s13  }
 0x467   : > { %p20_p2 = scmp.ge.s32.totalorder %s23_s13, 4  }
 0x469   :  { %22 = sbr.rel (!%p20_p2) target bundleno = 3 (0x3), region = 107 }
 0x46e   :  { %1408 = vsyncpa [#allocation3], 1 }
 0x46f   :  { %1410 = vsyncpa [#allocation3 + $0x1], 1 }
 0x470   :  { %1411 = vsyncpa [#allocation5], 1 }
 0x471   :  { %1412 = vsyncpa [#allocation8], 1 }

</bundles_post_ra>
